<compile_context>
chip_gen: v5e
topology: v5e:2x2
jax: 0.10.0
libtpu: 0.0.40
codegen_flags: <defaults>
</compile_context>

<pallas_src>
import functools

import jax
import jax.numpy as jnp
from jax import lax
from jax.experimental import pallas as pl
from jax.experimental.pallas import tpu as pltpu


# ---------------------------------------------------------------------------
# One-time parameter preparation (layout plumbing lives here, not per call).
# ---------------------------------------------------------------------------
def prepare_cross_attention_params(params, heads):
    """params: wq (qd, inner), wk (cd, inner), wv (cd, inner), wo (inner, qd),
    bo (qd,)  -- i.e. PyTorch weights already transposed to (in, out).

    Returns head-leading weights with the softmax scale folded into Wq:
      wq (H, qd, d), wk (H, cd, d), wv (H, cd, d), wo (H, d, qd), bo (1, qd).
    """
    wq, wk, wv, wo, bo = (params["wq"], params["wk"], params["wv"],
                          params["wo"], params["bo"])
    qd, inner = wq.shape
    cd = wk.shape[0]
    assert inner % heads == 0
    d = inner // heads
    scale = float(d) ** -0.5
    return {
        "wq": (wq * scale).reshape(qd, heads, d).transpose(1, 0, 2),  # (H, qd, d)
        "wk": wk.reshape(cd, heads, d).transpose(1, 0, 2),            # (H, cd, d)
        "wv": wv.reshape(cd, heads, d).transpose(1, 0, 2),            # (H, cd, d)
        "wo": wo.reshape(heads, d, qd),                               # (H, d, qd)
        "bo": bo.reshape(1, qd),
    }


def _choose_b_block(batch, n_rows, target_rows=256):
    """Largest divisor of `batch` whose row count stays <= target_rows (keeps the
    sublane dim of partial blocks 8-aligned); falls back to the smallest legal."""
    legal = [c for c in range(1, batch + 1)
             if batch % c == 0 and ((c * n_rows) % 8 == 0 or c == batch)]
    under = [c for c in legal if c * n_rows <= target_rows]
    return max(under) if under else min(legal)


# ---------------------------------------------------------------------------
# Fused CrossAttention kernel: one grid step = B_blk batch elements.
# ---------------------------------------------------------------------------
def _cross_attn_kernel(x_ref, ctx_ref, wq_ref, wk_ref, wv_ref, wo_ref, bo_ref,
                       o_ref, acc_ref, *, heads, b_blk, n, m, mxu_dtype):
    """Per-grid-step ref shapes:
       x_ref   : (B_blk*N, qd)   row-flattened queries
       ctx_ref : (B_blk*M, cd)   row-flattened context
       wq_ref  : (H, qd, d)      scale folded in
       wk_ref  : (H, cd, d)
       wv_ref  : (H, cd, d)
       wo_ref  : (H, d, qd)
       bo_ref  : (1, qd)
       o_ref   : (B_blk, N, qd)
       acc_ref : (B_blk*N, qd)   f32 VMEM accumulator
    """
    qd = x_ref.shape[-1]
    d = wq_ref.shape[-1]
    rows_q = b_blk * n

    x = x_ref[...]        # (B_blk*N, qd) -- stays in input dtype for the MXU
    ctx = ctx_ref[...]    # (B_blk*M, cd)

    # Initialize the accumulator with the output-projection bias (f32).
    acc_ref[...] = jnp.broadcast_to(bo_ref[...].astype(jnp.float32), (rows_q, qd))

    def head_body(h, carry):
        # Per-head projections via leading-dim weight indexing (no lane slicing);
        # all batch rows go through the MXU in one pass, f32 accumulation.
        qh = jnp.dot(x, wq_ref[h], preferred_element_type=jnp.float32)    # (Bb*N, d)
        kh = jnp.dot(ctx, wk_ref[h], preferred_element_type=jnp.float32)  # (Bb*M, d)
        vh = jnp.dot(ctx, wv_ref[h], preferred_element_type=jnp.float32)  # (Bb*M, d)

        # Narrow MXU operands when inputs are bf16 (leading-dim-only reshapes).
        qb = qh.astype(mxu_dtype).reshape(b_blk, n, d)
        kb = kh.astype(mxu_dtype).reshape(b_blk, m, d)
        vb = vh.astype(mxu_dtype).reshape(b_blk, m, d)

        # Scores contract on d per batch element (no k-transpose copy).
        s = jnp.einsum("bnd,bmd->bnm", qb, kb,
                       preferred_element_type=jnp.float32)                # (Bb, N, M)

        # Numerically-stable softmax; elementwise math kept in f32,
        # single approximate reciprocal per row (EUP slot).
        s_max = jnp.max(s, axis=-1, keepdims=True)
        p = jnp.exp(s - s_max)
        denom = jnp.sum(p, axis=-1, keepdims=True)
        p = p * pl.reciprocal(denom, approx=True)

        ob = jnp.einsum("bnm,bmd->bnd", p.astype(mxu_dtype), vb,
                        preferred_element_type=jnp.float32)               # (Bb, N, d)
        oh = ob.reshape(rows_q, d).astype(mxu_dtype)

        # Fused output projection contribution for this head.
        acc_ref[...] = acc_ref[...] + jnp.dot(
            oh, wo_ref[h], preferred_element_type=jnp.float32)            # (Bb*N, qd)
        return carry

    lax.fori_loop(0, heads, head_body, 0, unroll=True)

    o_ref[...] = acc_ref[...].reshape(b_blk, n, qd).astype(o_ref.dtype)


# ---------------------------------------------------------------------------
# Full CrossAttention forward (expects prepared params).
# ---------------------------------------------------------------------------
def cross_attention_forward(x, context, prep, heads, *, b_block=None):
    B, N, qd = x.shape
    if context is None:
        context = x
    _, M, cd = context.shape
    wq, wk, wv, wo, bo = (prep["wq"], prep["wk"], prep["wv"],
                          prep["wo"], prep["bo"])
    d = wq.shape[-1]

    if b_block is None:
        b_block = _choose_b_block(B, N)
    assert B % b_block == 0
    num_steps = B // b_block

    # bf16 second-stage operands when inputs are bf16; f32 otherwise.
    mxu_dtype = jnp.bfloat16 if x.dtype == jnp.bfloat16 else jnp.float32

    # Flatten batch rows in the wrapper (free metadata reshape) so the kernel's
    # projection matmuls see B_blk*N / B_blk*M rows per MXU pass.
    x2 = x.reshape(B * N, qd)
    c2 = context.reshape(B * M, cd)

    kern = functools.partial(_cross_attn_kernel, heads=heads, b_blk=b_block,
                             n=N, m=M, mxu_dtype=mxu_dtype)

    return pl.pallas_call(
        kern,
        out_shape=jax.ShapeDtypeStruct((B, N, qd), x.dtype),
        grid=(num_steps,),
        in_specs=[
            pl.BlockSpec((b_block * N, qd), lambda i: (i, 0)),     # x rows
            pl.BlockSpec((b_block * M, cd), lambda i: (i, 0)),     # context rows
            pl.BlockSpec((heads, qd, d), lambda i: (0, 0, 0)),     # Wq (resident)
            pl.BlockSpec((heads, cd, d), lambda i: (0, 0, 0)),     # Wk (resident)
            pl.BlockSpec((heads, cd, d), lambda i: (0, 0, 0)),     # Wv (resident)
            pl.BlockSpec((heads, d, qd), lambda i: (0, 0, 0)),     # Wo (resident)
            pl.BlockSpec((1, qd), lambda i: (0, 0)),               # bias (resident)
        ],
        out_specs=pl.BlockSpec((b_block, N, qd), lambda i: (i, 0, 0)),
        scratch_shapes=[pltpu.VMEM((b_block * N, qd), jnp.float32)],
        compiler_params=pltpu.CompilerParams(dimension_semantics=("parallel",)),
    )(x2, c2, wq, wk, wv, wo, bo)


# ---------------------------------------------------------------------------
# Pure-JAX reference for correctness checking (original (in, out) weights).
# ---------------------------------------------------------------------------
def reference_forward(x, context, params, heads):
    B, N, qd = x.shape
    if context is None:
        context = x
    _, M, cd = context.shape
    wq, wk, wv, wo, bo = (params["wq"], params["wk"], params["wv"],
                          params["wo"], params["bo"])
    inner = wq.shape[1]
    d = inner // heads
    scale = float(d) ** -0.5

    q = (x.reshape(B * N, qd) @ wq).reshape(B, N, heads, d).transpose(0, 2, 1, 3)
    k = (context.reshape(B * M, cd) @ wk).reshape(B, M, heads, d).transpose(0, 2, 1, 3)
    v = (context.reshape(B * M, cd) @ wv).reshape(B, M, heads, d).transpose(0, 2, 1, 3)
    sim = jnp.einsum("bhnd,bhmd->bhnm", q * scale, k)
    p = jax.nn.softmax(sim, axis=-1)
    out = jnp.einsum("bhnm,bhmd->bhnd", p, v)
    out = out.transpose(0, 2, 1, 3).reshape(B * N, inner)
    return (out @ wo + bo).reshape(B, N, qd)


if __name__ == "__main__":
    # Module config: query_dim=32, context_dim=16, heads=2, dim_head=16, dropout=0
    B, N, M = 2, 8, 12
    query_dim, context_dim = 32, 16
    heads, dim_head = 2, 16
    inner_dim = heads * dim_head

    key = jax.random.PRNGKey(0)
    kx, kc, k1, k2, k3, k4, k5 = jax.random.split(key, 7)

    x = jax.random.normal(kx, (B, N, query_dim), dtype=jnp.float32)
    context = jax.random.normal(kc, (B, M, context_dim), dtype=jnp.float32)

    # Weights stored as (in, out) = PyTorch weight.T
    params = {
        "wq": 0.05 * jax.random.normal(k1, (query_dim, inner_dim), dtype=jnp.float32),
        "wk": 0.05 * jax.random.normal(k2, (context_dim, inner_dim), dtype=jnp.float32),
        "wv": 0.05 * jax.random.normal(k3, (context_dim, inner_dim), dtype=jnp.float32),
        "wo": 0.05 * jax.random.normal(k4, (inner_dim, query_dim), dtype=jnp.float32),
        "bo": 0.01 * jax.random.normal(k5, (query_dim,), dtype=jnp.float32),
    }

    # One-time parameter preparation (head-leading layout, scale folded into Wq).
    prep = prepare_cross_attention_params(params, heads)

    out = cross_attention_forward(x, context, prep, heads)
    out = jax.block_until_ready(out)

    ref = reference_forward(x, context, params, heads)
    assert out.shape == (B, N, query_dim)
    # Tolerance accounts for the EUP approximate reciprocal in the softmax.
    assert jnp.allclose(out, ref, rtol=2e-3, atol=2e-3), "mismatch vs reference"

    print("KERNEL_OK")
</pallas_src>

<mosaic_0001>
module attributes {stable_mosaic.version = 11 : i64} {
  func.func @_cross_attn_kernel(%arg0: i32, %arg1: memref<16x32xf32, #tpu.memory_space<vmem>>, %arg2: memref<24x16xf32, #tpu.memory_space<vmem>>, %arg3: memref<2x32x16xf32, #tpu.memory_space<vmem>>, %arg4: memref<2x16x16xf32, #tpu.memory_space<vmem>>, %arg5: memref<2x16x16xf32, #tpu.memory_space<vmem>>, %arg6: memref<2x16x32xf32, #tpu.memory_space<vmem>>, %arg7: memref<1x32xf32, #tpu.memory_space<vmem>>, %arg8: memref<2x8x32xf32, #tpu.memory_space<vmem>>, %arg9: memref<16x32xf32, #tpu.memory_space<vmem>>) attributes {dimension_semantics = [#tpu.dimension_semantics<parallel>], iteration_bounds = array<i64: 1>, scalar_prefetch = 0 : i64, scratch_operands = 1 : i64, tpu.core_type = #tpu.core_type<tc>, window_params = [{transform_indices = @transform_0, window_bounds = array<i64: 16, 32>}, {transform_indices = @transform_1, window_bounds = array<i64: 24, 16>}, {pipeline_mode = #tpu.pipeline_mode<synchronous>, transform_indices = @transform_2, window_bounds = array<i64: 2, 32, 16>}, {pipeline_mode = #tpu.pipeline_mode<synchronous>, transform_indices = @transform_3, window_bounds = array<i64: 2, 16, 16>}, {pipeline_mode = #tpu.pipeline_mode<synchronous>, transform_indices = @transform_4, window_bounds = array<i64: 2, 16, 16>}, {pipeline_mode = #tpu.pipeline_mode<synchronous>, transform_indices = @transform_5, window_bounds = array<i64: 2, 16, 32>}, {pipeline_mode = #tpu.pipeline_mode<synchronous>, transform_indices = @transform_6, window_bounds = array<i64: 1, 32>}, {transform_indices = @transform_7, window_bounds = array<i64: 2, 8, 32>}]} {
    %c0 = arith.constant 0 : index
    %c0_0 = arith.constant 0 : index
    %0 = vector.load %arg1[%c0, %c0_0] : memref<16x32xf32, #tpu.memory_space<vmem>>, vector<16x32xf32>
    %c0_1 = arith.constant 0 : index
    %c0_2 = arith.constant 0 : index
    %1 = vector.load %arg2[%c0_1, %c0_2] : memref<24x16xf32, #tpu.memory_space<vmem>>, vector<24x16xf32>
    %c0_3 = arith.constant 0 : index
    %c0_4 = arith.constant 0 : index
    %2 = vector.load %arg7[%c0_3, %c0_4] : memref<1x32xf32, #tpu.memory_space<vmem>>, vector<1x32xf32>
    %3 = vector.shape_cast %2 : vector<1x32xf32> to vector<1x32xf32>
    %4 = vector.broadcast %3 : vector<1x32xf32> to vector<16x32xf32>
    %c0_5 = arith.constant 0 : index
    %c0_6 = arith.constant 0 : index
    %5 = vector.load %arg9[%c0_5, %c0_6] : memref<16x32xf32, #tpu.memory_space<vmem>>, vector<16x32xf32>
    tpu.vector_store %arg9[%c0_5, %c0_6], %4 {strides = array<i32>} : memref<16x32xf32, #tpu.memory_space<vmem>>, vector<16x32xf32>,
    %c0_i32 = arith.constant 0 : i32
    %6 = arith.index_cast %c0_i32 : i32 to index
    %c0_7 = arith.constant 0 : index
    %c0_8 = arith.constant 0 : index
    %7 = vector.load %arg3[%6, %c0_7, %c0_8] : memref<2x32x16xf32, #tpu.memory_space<vmem>>, vector<1x32x16xf32>
    %8 = vector.shape_cast %7 : vector<1x32x16xf32> to vector<32x16xf32>
    %cst = arith.constant dense<0.000000e+00> : vector<16x16xf32>
    %9 = tpu.matmul %0, %8, %cst {dimension_numbers = #tpu.dot_dimension_numbers<[1], [0], [0], [1], [0, 0, 1, 1], [], []>} : vector<16x32xf32>, vector<32x16xf32>, vector<16x16xf32> -> vector<16x16xf32>
    %10 = arith.index_cast %c0_i32 : i32 to index
    %c0_9 = arith.constant 0 : index
    %c0_10 = arith.constant 0 : index
    %11 = vector.load %arg4[%10, %c0_9, %c0_10] : memref<2x16x16xf32, #tpu.memory_space<vmem>>, vector<1x16x16xf32>
    %12 = vector.shape_cast %11 : vector<1x16x16xf32> to vector<16x16xf32>
    %cst_11 = arith.constant dense<0.000000e+00> : vector<24x16xf32>
    %13 = tpu.matmul %1, %12, %cst_11 {dimension_numbers = #tpu.dot_dimension_numbers<[1], [0], [0], [1], [0, 0, 1, 1], [], []>} : vector<24x16xf32>, vector<16x16xf32>, vector<24x16xf32> -> vector<24x16xf32>
    %14 = arith.index_cast %c0_i32 : i32 to index
    %c0_12 = arith.constant 0 : index
    %c0_13 = arith.constant 0 : index
    %15 = vector.load %arg5[%14, %c0_12, %c0_13] : memref<2x16x16xf32, #tpu.memory_space<vmem>>, vector<1x16x16xf32>
    %16 = vector.shape_cast %15 : vector<1x16x16xf32> to vector<16x16xf32>
    %cst_14 = arith.constant dense<0.000000e+00> : vector<24x16xf32>
    %17 = tpu.matmul %1, %16, %cst_14 {dimension_numbers = #tpu.dot_dimension_numbers<[1], [0], [0], [1], [0, 0, 1, 1], [], []>} : vector<24x16xf32>, vector<16x16xf32>, vector<24x16xf32> -> vector<24x16xf32>
    %18 = vector.shape_cast %9 : vector<16x16xf32> to vector<2x8x16xf32>
    %19 = vector.shape_cast %13 : vector<24x16xf32> to vector<2x12x16xf32>
    %20 = vector.shape_cast %17 : vector<24x16xf32> to vector<2x12x16xf32>
    "tpu.trace_start"() <{level = 10 : i32, message = "bnd,bmd->bnm"}> : () -> ()
    %cst_15 = arith.constant dense<0.000000e+00> : vector<2x8x12xf32>
    %21 = tpu.matmul %18, %19, %cst_15 {dimension_numbers = #tpu.dot_dimension_numbers<[2], [2], [1], [1], [0, 0, 0, 1, 1, 1], [0], [0]>} : vector<2x8x16xf32>, vector<2x12x16xf32>, vector<2x8x12xf32> -> vector<2x8x12xf32>
    "tpu.trace_stop"() : () -> ()
    %cst_16 = arith.constant dense<0xFF800000> : vector<2x8xf32>
    %22 = vector.multi_reduction <maximumf>, %21, %cst_16 [2] : vector<2x8x12xf32> to vector<2x8xf32>
    %23 = vector.shape_cast %22 : vector<2x8xf32> to vector<2x8x1xf32>
    %24 = vector.broadcast %23 : vector<2x8x1xf32> to vector<2x8x12xf32>
    %25 = arith.subf %21, %24 : vector<2x8x12xf32>
    %26 = math.exp %25 : vector<2x8x12xf32>
    %cst_17 = arith.constant dense<0.000000e+00> : vector<2x8xf32>
    %27 = vector.multi_reduction <add>, %26, %cst_17 [2] : vector<2x8x12xf32> to vector<2x8xf32>
    %28 = vector.shape_cast %27 : vector<2x8xf32> to vector<2x8x1xf32>
    %29 = tpu.reciprocal %28 {approx = true} : vector<2x8x1xf32> -> vector<2x8x1xf32>
    %30 = vector.broadcast %29 : vector<2x8x1xf32> to vector<2x8x12xf32>
    %31 = arith.mulf %26, %30 : vector<2x8x12xf32>
    "tpu.trace_start"() <{level = 10 : i32, message = "bnm,bmd->bnd"}> : () -> ()
    %cst_18 = arith.constant dense<0.000000e+00> : vector<2x8x16xf32>
    %32 = tpu.matmul %31, %20, %cst_18 {dimension_numbers = #tpu.dot_dimension_numbers<[2], [1], [1], [2], [0, 0, 0, 1, 1, 2], [0], [0]>} : vector<2x8x12xf32>, vector<2x12x16xf32>, vector<2x8x16xf32> -> vector<2x8x16xf32>
    "tpu.trace_stop"() : () -> ()
    %33 = vector.shape_cast %32 : vector<2x8x16xf32> to vector<16x16xf32>
    %c0_19 = arith.constant 0 : index
    %c0_20 = arith.constant 0 : index
    %34 = vector.load %arg9[%c0_19, %c0_20] : memref<16x32xf32, #tpu.memory_space<vmem>>, vector<16x32xf32>
    %35 = arith.index_cast %c0_i32 : i32 to index
    %c0_21 = arith.constant 0 : index
    %c0_22 = arith.constant 0 : index
    %36 = vector.load %arg6[%35, %c0_21, %c0_22] : memref<2x16x32xf32, #tpu.memory_space<vmem>>, vector<1x16x32xf32>
    %37 = vector.shape_cast %36 : vector<1x16x32xf32> to vector<16x32xf32>
    %cst_23 = arith.constant dense<0.000000e+00> : vector<16x32xf32>
    %38 = tpu.matmul %33, %37, %cst_23 {dimension_numbers = #tpu.dot_dimension_numbers<[1], [0], [0], [1], [0, 0, 1, 1], [], []>} : vector<16x16xf32>, vector<16x32xf32>, vector<16x32xf32> -> vector<16x32xf32>
    %39 = arith.addf %34, %38 : vector<16x32xf32>
    %c0_24 = arith.constant 0 : index
    %c0_25 = arith.constant 0 : index
    %40 = vector.load %arg9[%c0_24, %c0_25] : memref<16x32xf32, #tpu.memory_space<vmem>>, vector<16x32xf32>
    tpu.vector_store %arg9[%c0_24, %c0_25], %39 {strides = array<i32>} : memref<16x32xf32, #tpu.memory_space<vmem>>, vector<16x32xf32>,
    %c1_i32 = arith.constant 1 : i32
    %41 = arith.index_cast %c1_i32 : i32 to index
    %c0_26 = arith.constant 0 : index
    %c0_27 = arith.constant 0 : index
    %42 = vector.load %arg3[%41, %c0_26, %c0_27] : memref<2x32x16xf32, #tpu.memory_space<vmem>>, vector<1x32x16xf32>
    %43 = vector.shape_cast %42 : vector<1x32x16xf32> to vector<32x16xf32>
    %cst_28 = arith.constant dense<0.000000e+00> : vector<16x16xf32>
    %44 = tpu.matmul %0, %43, %cst_28 {dimension_numbers = #tpu.dot_dimension_numbers<[1], [0], [0], [1], [0, 0, 1, 1], [], []>} : vector<16x32xf32>, vector<32x16xf32>, vector<16x16xf32> -> vector<16x16xf32>
    %45 = arith.index_cast %c1_i32 : i32 to index
    %c0_29 = arith.constant 0 : index
    %c0_30 = arith.constant 0 : index
    %46 = vector.load %arg4[%45, %c0_29, %c0_30] : memref<2x16x16xf32, #tpu.memory_space<vmem>>, vector<1x16x16xf32>
    %47 = vector.shape_cast %46 : vector<1x16x16xf32> to vector<16x16xf32>
    %cst_31 = arith.constant dense<0.000000e+00> : vector<24x16xf32>
    %48 = tpu.matmul %1, %47, %cst_31 {dimension_numbers = #tpu.dot_dimension_numbers<[1], [0], [0], [1], [0, 0, 1, 1], [], []>} : vector<24x16xf32>, vector<16x16xf32>, vector<24x16xf32> -> vector<24x16xf32>
    %49 = arith.index_cast %c1_i32 : i32 to index
    %c0_32 = arith.constant 0 : index
    %c0_33 = arith.constant 0 : index
    %50 = vector.load %arg5[%49, %c0_32, %c0_33] : memref<2x16x16xf32, #tpu.memory_space<vmem>>, vector<1x16x16xf32>
    %51 = vector.shape_cast %50 : vector<1x16x16xf32> to vector<16x16xf32>
    %cst_34 = arith.constant dense<0.000000e+00> : vector<24x16xf32>
    %52 = tpu.matmul %1, %51, %cst_34 {dimension_numbers = #tpu.dot_dimension_numbers<[1], [0], [0], [1], [0, 0, 1, 1], [], []>} : vector<24x16xf32>, vector<16x16xf32>, vector<24x16xf32> -> vector<24x16xf32>
    %53 = vector.shape_cast %44 : vector<16x16xf32> to vector<2x8x16xf32>
    %54 = vector.shape_cast %48 : vector<24x16xf32> to vector<2x12x16xf32>
    %55 = vector.shape_cast %52 : vector<24x16xf32> to vector<2x12x16xf32>
    "tpu.trace_start"() <{level = 10 : i32, message = "bnd,bmd->bnm"}> : () -> ()
    %cst_35 = arith.constant dense<0.000000e+00> : vector<2x8x12xf32>
    %56 = tpu.matmul %53, %54, %cst_35 {dimension_numbers = #tpu.dot_dimension_numbers<[2], [2], [1], [1], [0, 0, 0, 1, 1, 1], [0], [0]>} : vector<2x8x16xf32>, vector<2x12x16xf32>, vector<2x8x12xf32> -> vector<2x8x12xf32>
    "tpu.trace_stop"() : () -> ()
    %cst_36 = arith.constant dense<0xFF800000> : vector<2x8xf32>
    %57 = vector.multi_reduction <maximumf>, %56, %cst_36 [2] : vector<2x8x12xf32> to vector<2x8xf32>
    %58 = vector.shape_cast %57 : vector<2x8xf32> to vector<2x8x1xf32>
    %59 = vector.broadcast %58 : vector<2x8x1xf32> to vector<2x8x12xf32>
    %60 = arith.subf %56, %59 : vector<2x8x12xf32>
    %61 = math.exp %60 : vector<2x8x12xf32>
    %cst_37 = arith.constant dense<0.000000e+00> : vector<2x8xf32>
    %62 = vector.multi_reduction <add>, %61, %cst_37 [2] : vector<2x8x12xf32> to vector<2x8xf32>
    %63 = vector.shape_cast %62 : vector<2x8xf32> to vector<2x8x1xf32>
    %64 = tpu.reciprocal %63 {approx = true} : vector<2x8x1xf32> -> vector<2x8x1xf32>
    %65 = vector.broadcast %64 : vector<2x8x1xf32> to vector<2x8x12xf32>
    %66 = arith.mulf %61, %65 : vector<2x8x12xf32>
    "tpu.trace_start"() <{level = 10 : i32, message = "bnm,bmd->bnd"}> : () -> ()
    %cst_38 = arith.constant dense<0.000000e+00> : vector<2x8x16xf32>
    %67 = tpu.matmul %66, %55, %cst_38 {dimension_numbers = #tpu.dot_dimension_numbers<[2], [1], [1], [2], [0, 0, 0, 1, 1, 2], [0], [0]>} : vector<2x8x12xf32>, vector<2x12x16xf32>, vector<2x8x16xf32> -> vector<2x8x16xf32>
    "tpu.trace_stop"() : () -> ()
    %68 = vector.shape_cast %67 : vector<2x8x16xf32> to vector<16x16xf32>
    %c0_39 = arith.constant 0 : index
    %c0_40 = arith.constant 0 : index
    %69 = vector.load %arg9[%c0_39, %c0_40] : memref<16x32xf32, #tpu.memory_space<vmem>>, vector<16x32xf32>
    %70 = arith.index_cast %c1_i32 : i32 to index
    %c0_41 = arith.constant 0 : index
    %c0_42 = arith.constant 0 : index
    %71 = vector.load %arg6[%70, %c0_41, %c0_42] : memref<2x16x32xf32, #tpu.memory_space<vmem>>, vector<1x16x32xf32>
    %72 = vector.shape_cast %71 : vector<1x16x32xf32> to vector<16x32xf32>
    %cst_43 = arith.constant dense<0.000000e+00> : vector<16x32xf32>
    %73 = tpu.matmul %68, %72, %cst_43 {dimension_numbers = #tpu.dot_dimension_numbers<[1], [0], [0], [1], [0, 0, 1, 1], [], []>} : vector<16x16xf32>, vector<16x32xf32>, vector<16x32xf32> -> vector<16x32xf32>
    %74 = arith.addf %69, %73 : vector<16x32xf32>
    %c0_44 = arith.constant 0 : index
    %c0_45 = arith.constant 0 : index
    %75 = vector.load %arg9[%c0_44, %c0_45] : memref<16x32xf32, #tpu.memory_space<vmem>>, vector<16x32xf32>
    tpu.vector_store %arg9[%c0_44, %c0_45], %74 {strides = array<i32>} : memref<16x32xf32, #tpu.memory_space<vmem>>, vector<16x32xf32>,
    %c2_i32 = arith.constant 2 : i32
    %c0_46 = arith.constant 0 : index
    %c0_47 = arith.constant 0 : index
    %76 = vector.load %arg9[%c0_46, %c0_47] : memref<16x32xf32, #tpu.memory_space<vmem>>, vector<16x32xf32>
    %77 = vector.shape_cast %76 : vector<16x32xf32> to vector<2x8x32xf32>
    %c0_48 = arith.constant 0 : index
    %c0_49 = arith.constant 0 : index
    %c0_50 = arith.constant 0 : index
    %78 = vector.load %arg8[%c0_48, %c0_49, %c0_50] : memref<2x8x32xf32, #tpu.memory_space<vmem>>, vector<2x8x32xf32>
    tpu.vector_store %arg8[%c0_48, %c0_49, %c0_50], %77 {strides = array<i32>} : memref<2x8x32xf32, #tpu.memory_space<vmem>>, vector<2x8x32xf32>,
    return
  }
  func.func @transform_0(%arg0: i32) -> (i32, i32) {
    %c0_i32 = arith.constant 0 : i32
    %c0_i32_0 = arith.constant 0 : i32
    return %arg0, %c0_i32 : i32, i32
  }
  func.func @transform_1(%arg0: i32) -> (i32, i32) {
    %c0_i32 = arith.constant 0 : i32
    %c0_i32_0 = arith.constant 0 : i32
    return %arg0, %c0_i32 : i32, i32
  }
  func.func @transform_2(%arg0: i32) -> (i32, i32, i32) {
    %c0_i32 = arith.constant 0 : i32
    %c0_i32_0 = arith.constant 0 : i32
    %c0_i32_1 = arith.constant 0 : i32
    %c0_i32_2 = arith.constant 0 : i32
    return %c0_i32, %c0_i32_0, %c0_i32_1 : i32, i32, i32
  }
  func.func @transform_3(%arg0: i32) -> (i32, i32, i32) {
    %c0_i32 = arith.constant 0 : i32
    %c0_i32_0 = arith.constant 0 : i32
    %c0_i32_1 = arith.constant 0 : i32
    %c0_i32_2 = arith.constant 0 : i32
    return %c0_i32, %c0_i32_0, %c0_i32_1 : i32, i32, i32
  }
  func.func @transform_4(%arg0: i32) -> (i32, i32, i32) {
    %c0_i32 = arith.constant 0 : i32
    %c0_i32_0 = arith.constant 0 : i32
    %c0_i32_1 = arith.constant 0 : i32
    %c0_i32_2 = arith.constant 0 : i32
    return %c0_i32, %c0_i32_0, %c0_i32_1 : i32, i32, i32
  }
  func.func @transform_5(%arg0: i32) -> (i32, i32, i32) {
    %c0_i32 = arith.constant 0 : i32
    %c0_i32_0 = arith.constant 0 : i32
    %c0_i32_1 = arith.constant 0 : i32
    %c0_i32_2 = arith.constant 0 : i32
    return %c0_i32, %c0_i32_0, %c0_i32_1 : i32, i32, i32
  }
  func.func @transform_6(%arg0: i32) -> (i32, i32) {
    %c0_i32 = arith.constant 0 : i32
    %c0_i32_0 = arith.constant 0 : i32
    %c0_i32_1 = arith.constant 0 : i32
    return %c0_i32, %c0_i32_0 : i32, i32
  }
  func.func @transform_7(%arg0: i32) -> (i32, i32, i32) {
    %c0_i32 = arith.constant 0 : i32
    %c0_i32_0 = arith.constant 0 : i32
    %c0_i32_1 = arith.constant 0 : i32
    return %arg0, %c0_i32, %c0_i32_0 : i32, i32, i32
  }
}

</mosaic_0001>

<bundles_post_ra>
// kernel: tpu_custom_call.1
= control target key start
LH: loop header
LB: loop body
LE: loop exit
PB: predicated region body
PF: predicated region fallthrough
CT: control target
= control target key end

     0   :  { %12 = vsyncpa [#allocation4], 0  ;;  %s1013_s0 = inlined_call_operand.hbm [shape: f32[16,32], index: 0, kind: input, shape index: {}]   ;;  %s1014_s1 = inlined_call_operand.vmem [shape: f32[24,16], index: 1, kind: input, shape index: {}]   ;;  %s1015_s2 = inlined_call_operand.vmem [shape: f32[2,32,16], index: 2, kind: input, shape index: {}]   ;;  %s1016_s3 = inlined_call_operand.vmem [shape: f32[2,16,16], index: 3, kind: input, shape index: {}]   ;;  %s1017_s4 = inlined_call_operand.vmem [shape: f32[2,16,16], index: 4, kind: input, shape index: {}]   ;;  %s1018_s5 = inlined_call_operand.vmem [shape: f32[2,16,32], index: 5, kind: input, shape index: {}]   ;;  %s1019_s6 = inlined_call_operand.vmem [shape: f32[1,32], index: 6, kind: input, shape index: {}]   ;;  %s1020_s7 = inlined_call_operand.hbm [shape: f32[2,8,32], index: 7, kind: output, shape index: {}]  }
   0x1   :  { %13 = vsyncpa [#allocation5], 0  ;;  %s18_s26 = sshll.u32 %s1013_s0, 4  ;;  %s803_s27 = smov [#allocation3]   ;;  %s19_s26 = int_to_ptr.hbm [resolvable:$true] %s18_s26 }
   0x2   :  { %s20_s28 = sshll.u32 %s803_s27, 4  ;;  %s804_s29 = smov 128   ;;  %s21_s28 = int_to_ptr.vmem [resolvable:$true] %s20_s28 }
   0x3   :  { %s805_s30 = smov 8  }
   0x4   :  { %26 = dma.hbm_to_vmem [thread:$0]  %s19_s26, 256, %s21_s28, [#allocation4], %s804_s29, %s804_s29, %s805_s30  }
   0x5   :  { %799 = dma.done.wait [#allocation4], 256  }
   0x6   :  { %800 = vsyncadd [#allocation4], 4294967040  ;;  %v89_v0 = vld [vmem:[%s1016_s3 + $0x8] sm:$0xff]  ;;  %v88_v1 = vld [vmem:[%s1016_s3] sm:$0xff]  ;;  %vm90_vm0 = vcmask 130048   ;;  %vm52_vm1 = vcmask 261120  }
   0x7   :  { %114 = vmatpush.msra.mxu1 %v89_v0  ;;  %v862_v2 = vld [vmem:[%s1014_s1] sm:$0xff]  ;;  %v58_v3 = vld [vmem:[%s1015_s2 + $0x18] sm:$0xff]  ;;  %v57_v4 = vld [vmem:[%s1015_s2 + $0x10] sm:$0xff]  ;;  %vm234_vm2 = vcmask 97280   ;;  %vm268_vm3 = vcmask 1043456   ;;  %s663_s9 = sshll.u32 %s1020_s7, 4  ;;  %s664_s9 = int_to_ptr.hbm [resolvable:$true] %s663_s9 }
   0x8   :  { %77 = vmatpush.msra.mxu0 %v58_v3  ;;  %726 = vmatpush.msra.mxu3 %v58_v3  ;;  %v56_v5 = vld [vmem:[%s1015_s2 + $0x8] sm:$0xff]  ;;  %v55_v6 = vld [vmem:[%s1015_s2] sm:$0xff]  ;;  %v878_v7 = vld [vmem:[#allocation3] sm:$0xff] }
   0x9   :  { %115 = vmatpush.msra.mxu1 %v88_v1  ;;  %v880_v8 = vld [vmem:[#allocation3 + $0x8] sm:$0xff]  ;;  %v885_v9 = vld [vmem:[%s1014_s1 + $0x8] sm:$0xff]  ;;  %v896_v10 = vld [vmem:[%s1014_s1 + $0x10] sm:$0xff] }
   0xa   :  { %678 = vmatmul.msk.f32.vlgmr.msra.gmra.mxu1 %vm90_vm0, %v862_v2  ;;  %78 = vmatpush.msra.mxu0 %v57_v4  ;;  %v127_v23 = vld [vmem:[%s1017_s4 + $0x8] sm:$0xff]  ;;  %v126_v24 = vld [vmem:[%s1017_s4] sm:$0xff]  ;;  %v703_v49 = vld [vmem:[%s1016_s3 + $0x18] sm:$0xff] }
   0xb   :  { %727 = vmatpush.msra.mxu3 %v57_v4  ;;  %142 = vmatpush.msra.mxu2 %v127_v23  ;;  %v702_v50 = vld [vmem:[%s1016_s3 + $0x10] sm:$0xff]  ;;  %v699_v51 = vld [vmem:[%s1015_s2 + $0x38] sm:$0xff]  ;;  %v697_v53 = vld [vmem:[%s1015_s2 + $0x28] sm:$0xff] }
   0xc   :  { %79 = vmatpush.msra.mxu0 %v56_v5  ;;  %v698_v52 = vld [vmem:[%s1015_s2 + $0x30] sm:$0xff]  ;;  %v696_v54 = vld [vmem:[%s1015_s2 + $0x20] sm:$0xff]  ;;  %v327_v56 = vld [vmem:[%s1018_s5 + $0x8] sm:$0xff] }
   0xd   :  { %728 = vmatpush.msra.mxu3 %v56_v5  ;;  %143 = vmatpush.msra.mxu2 %v126_v24  ;;  %v326_v62 = vld [vmem:[%s1018_s5] sm:$0xff]  ;;  %v708_v23 = vld [vmem:[%s1017_s4 + $0x18] sm:$0xff]  ;;  %v707_v24 = vld [vmem:[%s1017_s4 + $0x10] sm:$0xff] }
   0xe   :  { %80 = vmatpush.msra.mxu0 %v55_v6  ;;  %681 = vmatmul.msk.f32.vlgmr.msra.gmra.mxu2 %vm90_vm0, %v862_v2  ;;  %v734_v3 = vld [vmem:[%s1019_s6] ss:$0 sm:$0xff] }
   0xf   :  { %676 = vmatmul.msk.f32.vlgmr.msra.gmra.mxu0 %vm52_vm1, %v878_v7  ;;  %729 = vmatpush.msra.mxu3 %v55_v6  ;;  %53 = vst.msk [vmem:[#allocation2] sm:$0xff] %vm52_vm1, %v734_v3 }
  0x10   :  { %677 = vmatmul.msk.f32.vlgmr.msra.gmra.mxu3 %vm52_vm1, %v880_v8  ;;  %378 = vmatpush.msrb.mxu2 %v699_v51  ;;  %54 = vst.msk [vmem:[#allocation2 + $0x8] sm:$0xff] %vm52_vm1, %v734_v3 }
  0x11   :  { %348 = vmatpush.msrb.mxu1 %v327_v56 }
  0x12   :  { %679 = vmatmul.msk.f32.gmra.mxu1 %vm90_vm0, %v885_v9  ;;  %379 = vmatpush.msrb.mxu2 %v698_v52 }
  0x13   :  { %349 = vmatpush.msrb.mxu1 %v326_v62 }
  0x14   :  { %380 = vmatpush.msrb.mxu2 %v697_v53  ;;  %v722_v53 = vld [vmem:[%s1018_s5 + $0x10] sm:$0xff] }
  0x16   :  { %682 = vmatmul.msk.f32.gmra.mxu2 %vm90_vm0, %v885_v9 }
  0x17   :  { %381 = vmatpush.msrb.mxu2 %v696_v54 }
  0x1a   :  { %680 = vmatmul.msk.f32.gmra.mxu1 %vm90_vm0, %v896_v10 }
  0x1e   :  { %683 = vmatmul.msk.f32.gmra.mxu2 %vm90_vm0, %v896_v10 }
  0x26   :  { %700 = vmatmul.msk.f32.vlgmr.msrb.gmra.mxu2 %vm52_vm1, %v878_v7 }
  0x2e   :  { %701 = vmatmul.msk.f32.gmra.mxu2 %vm52_vm1, %v880_v8 }
  0x87   :  { %v117_v11 = vpop.f32.mrf.mxu1 }
  0x88   :  { %v157_v12 = vrot.slane %v117_v11, 4  ;;  %166 = vst [vmem:[#allocation1] ss:$2 sm:$0xff] %v117_v11 }
  0x8a   :  { %168 = vst [vmem:[#allocation1 + $0x1] ss:$2 sm:$0xff] %v157_v12 }
  0x8c   :  { %v82_v19 = vpop.f32.mrf.mxu0 }
  0x8f   :  { %v120_v13 = vpop.f32.mrf.mxu1 }
  0x90   :  { %v158_v14 = vrot.slane %v120_v13, 4  ;;  %170 = vst [vmem:[#allocation1 + $0x10] ss:$2 sm:$0xff] %v120_v13 }
  0x91   :  { %v171_v15 = vld.sshfl [vmem:[#allocation1] sm:$0xff pattern:$0x75316420]  ;;  %v145_v29 = vpop.f32.mrf.mxu2 }
  0x92   :  { %200 = vst [vmem:[#allocation1] ss:$2 sm:$0xff] %v158_v14  ;;  %v163_v30 = vrot.slane %v145_v29, 4 }
  0x93   :  { %v85_v22 = vpop.f32.mrf.mxu3 }
  0x97   :  { %v123_v16 = vpop.f32.mrf.mxu1  ;;  %v172_v17 = vld.sshfl [vmem:[#allocation1 + $0x10] sm:$0xff pattern:$0x75316420] }
  0x98   :  { %v159_v18 = vrot.slane %v123_v16, 4  ;;  %202 = vst [vmem:[#allocation1 + $0x1] ss:$2 sm:$0xff] %v123_v16  ;;  %684 = vmatpush.xpose.msk.msrb.mxu3 %vm90_vm0, %v172_v17  ;;  %v324_v17 = vld [vmem:[#allocation2] sm:$0xff] }
  0x99   :  { %v148_v34 = vpop.f32.mrf.mxu2 }
  0x9a   :  { %204 = vst [vmem:[#allocation1 + $0x10] ss:$2 sm:$0xff] %v159_v18  ;;  %v164_v35 = vrot.slane %v148_v34, 4 }
  0x9c   :  { %685 = vmatpush.xpose.msk.msrb.mxu3 %vm90_vm0, %v171_v15 }
  0x9f   :  { %686 = vmatmul.msk.f32.vlgmr.msrb.gmra.mxu3 %vm90_vm0, %v82_v19  ;;  %v205_v21 = vld.sshfl [vmem:[#allocation1] sm:$0xff pattern:$0x75316420] }
  0xa0   :  { %257 = vst [vmem:[#allocation1] ss:$2 sm:$0xff] %v145_v29 }
  0xa1   :  { %v206_v20 = vld.sshfl [vmem:[#allocation1 + $0x10] sm:$0xff pattern:$0x75316420]  ;;  %259 = vst [vmem:[#allocation1 + $0x1] ss:$2 sm:$0xff] %v163_v30  ;;  %v151_v42 = vpop.f32.mrf.mxu2 }
  0xa2   :  { %687 = vmatpush.xpose.msk.msra.mxu3 %vm90_vm0, %v206_v20  ;;  %261 = vst [vmem:[#allocation1 + $0x10] ss:$2 sm:$0xff] %v148_v34  ;;  %v165_v44 = vrot.slane %v151_v42, 4  ;;  %v325_v20 = vld [vmem:[#allocation2 + $0x8] sm:$0xff] }
  0xa6   :  { %688 = vmatpush.xpose.msk.msra.mxu3 %vm90_vm0, %v205_v21 }
  0xa8   :  { %v262_v36 = vld.sshfl [vmem:[#allocation1] sm:$0xff pattern:$0x75316420] }
  0xa9   :  { %689 = vmatmul.msk.f32.vlgmr.msra.gmra.mxu3 %vm90_vm0, %v85_v22  ;;  %291 = vst [vmem:[#allocation1] ss:$2 sm:$0xff] %v164_v35  ;;  %v263_v43 = vld.sshfl [vmem:[#allocation1 + $0x10] sm:$0xff pattern:$0x75316420]  ;;  %v383_v13 = vpop.f32.mrf.mxu2 }
  0xaa   :  { %293 = vst [vmem:[#allocation1 + $0x1] ss:$2 sm:$0xff] %v151_v42  ;;  %690 = vmatpush.msk.msrb.mxu0 %vm268_vm3, %v263_v43 }
  0xab   :  { %295 = vst [vmem:[#allocation1 + $0x10] ss:$2 sm:$0xff] %v165_v44 }
  0xac   :  { %286 = vmatpush.msrb.mxu0 %v262_v36 }
  0xae   :  { %406 = vmatpush.msra.mxu0 %v703_v49 }
  0xb0   :  { %407 = vmatpush.msra.mxu0 %v702_v50 }
  0xb1   :  { %v296_v48 = vld.sshfl [vmem:[#allocation1] sm:$0xff pattern:$0x75316420]  ;;  %v386_v16 = vpop.f32.mrf.mxu2 }
  0xb2   :  { %v297_v47 = vld.sshfl [vmem:[#allocation1 + $0x10] sm:$0xff pattern:$0x75316420] }
  0xb3   :  { %692 = vmatpush.msk.msrb.mxu3 %vm268_vm3, %v297_v47 }
  0xb5   :  { %319 = vmatpush.msrb.mxu3 %v296_v48 }
  0xb7   :  { %435 = vmatpush.msra.mxu3 %v708_v23 }
  0xb9   :  { %436 = vmatpush.msra.mxu3 %v707_v24 }
 0x122   :  { %v197_v25 = vpop.f32.mrf.mxu3 }
 0x123   :  { %v235_v26 = vsel %vm234_vm2, %v197_v25, -inf }
 0x124   :  { %236 = vmax.xlane.f32.xlu0 %v235_v26 }
 0x12c   :  { %v231_v27 = vpop.f32.mrf.mxu3 }
 0x12d   :  { %v238_v28 = vsel %vm234_vm2, %v231_v27, -inf }
 0x12e   :  { %239 = vmax.xlane.f32.xlu0 %v238_v28 }
 0x197   :  { %v237_v31 = vpop.xlane.xlu0 %236 }
 0x198   :  { %v241_v32 = vsub.f32 %v197_v25, %v237_v31 }
 0x19a   :  { %v243_v33 = vmul.f32 1.442695, %v241_v32 }
 0x19c   :  { %735 = vpow2.f32 %v243_v33 }
 0x1a1   :  { %v240_v37 = vpop.xlane.xlu0 %239 }
 0x1a2   :  { %v736_v38 = vpop.eup %735  ;;  %v242_v39 = vsub.f32 %v231_v27, %v240_v37 }
 0x1a3   :  { %v247_v40 = vsel %vm234_vm2, %v736_v38, 0.0 }
 0x1a4   :  { %v245_v41 = vmul.f32 1.442695, %v242_v39  ;;  %248 = vadd.xlane.f32.xlu1 %v247_v40 }
 0x1a6   :  { %737 = vpow2.f32 %v245_v41 }
 0x1ac   :  { %v738_v45 = vpop.eup %737 }
 0x1ad   :  { %v250_v46 = vsel %vm234_vm2, %v738_v45, 0.0 }
 0x1ae   :  { %251 = vadd.xlane.f32.xlu1 %v250_v46  ;;  %v723_v46 = vld [vmem:[%s1018_s5 + $0x18] sm:$0xff]  ;;  %s806_s5 = smov [#allocation6]  }
 0x1af   :  { %s661_s27 = sshll.u32 %s806_s5, 4  ;;  %s662_s27 = int_to_ptr.vmem [resolvable:$true] %s661_s27 }
 0x217   :  { %v249_v55 = vpop.xlane.xlu1 %248 }
 0x218   :  { %739 = vrcp.f32 %v249_v55 }
 0x21e   :  { %v740_v57 = vpop.eup %739 }
 0x21f   :  { %v255_v58 = vmul.f32 %v740_v57, %v736_v38 }
 0x221   :  { %691 = vmatmul.msk.f32.vlgmr.msrb.gmra.mxu0 %vm234_vm2, %v255_v58  ;;  %v252_v59 = vpop.xlane.xlu1 %251 }
 0x222   :  { %741 = vrcp.f32 %v252_v59  ;;  %640 = vmatpush.msrb.mxu0 %v723_v46 }
 0x224   :  { %641 = vmatpush.msrb.mxu0 %v722_v53 }
 0x228   :  { %v742_v60 = vpop.eup %741 }
 0x229   :  { %v256_v61 = vmul.f32 %v742_v60, %v738_v45  ;;  %704 = vmatmul.msk.f32.vlgmr.msra.gmra.mxu0 %vm90_vm0, %v862_v2 }
 0x22b   :  { %693 = vmatmul.msk.f32.vlgmr.msrb.gmra.mxu3 %vm234_vm2, %v256_v61 }
 0x231   :  { %705 = vmatmul.msk.f32.gmra.mxu0 %vm90_vm0, %v885_v9 }
 0x233   :  { %709 = vmatmul.msk.f32.vlgmr.msra.gmra.mxu3 %vm90_vm0, %v862_v2 }
 0x239   :  { %706 = vmatmul.msk.f32.gmra.mxu0 %vm90_vm0, %v896_v10 }
 0x23b   :  { %710 = vmatmul.msk.f32.gmra.mxu3 %vm90_vm0, %v885_v9 }
 0x243   :  { %711 = vmatmul.msk.f32.gmra.mxu3 %vm90_vm0, %v896_v10 }
 0x29e   :  { %v288_v63 = vpop.f32.mrf.mxu0 }
 0x29f   :  { %694 = vmatmul.msk.f32.vlgmr.msrb.gmra.mxu1 %vm90_vm0, %v288_v63 }
 0x2a6   :  { %v409_v0 = vpop.f32.mrf.mxu0 }
 0x2a7   :  { %v450_v1 = vrot.slane %v409_v0, 4  ;;  %459 = vst [vmem:[#allocation1] ss:$2 sm:$0xff] %v409_v0 }
 0x2a9   :  { %461 = vst [vmem:[#allocation1 + $0x1] ss:$2 sm:$0xff] %v450_v1 }
 0x2ae   :  { %v321_v4 = vpop.f32.mrf.mxu3  ;;  %v412_v5 = vpop.f32.mrf.mxu0 }
 0x2af   :  { %v451_v6 = vrot.slane %v412_v5, 4  ;;  %463 = vst [vmem:[#allocation1 + $0x10] ss:$2 sm:$0xff] %v412_v5  ;;  %695 = vmatmul.msk.f32.gmra.mxu1 %vm90_vm0, %v321_v4 }
 0x2b0   :  { %v464_v7 = vld.sshfl [vmem:[#allocation1] sm:$0xff pattern:$0x75316420] }
 0x2b1   :  { %493 = vst [vmem:[#allocation1] ss:$2 sm:$0xff] %v451_v6 }
 0x2b6   :  { %v415_v8 = vpop.f32.mrf.mxu0  ;;  %v465_v11 = vld.sshfl [vmem:[#allocation1 + $0x10] sm:$0xff pattern:$0x75316420]  ;;  %v438_v32 = vpop.f32.mrf.mxu3 }
 0x2b7   :  { %v452_v12 = vrot.slane %v415_v8, 4  ;;  %712 = vmatpush.xpose.msk.msra.mxu1 %vm90_vm0, %v465_v11  ;;  %495 = vst [vmem:[#allocation1 + $0x1] ss:$2 sm:$0xff] %v415_v8  ;;  %v456_v2 = vrot.slane %v438_v32, 4 }
 0x2b9   :  { %497 = vst [vmem:[#allocation1 + $0x10] ss:$2 sm:$0xff] %v452_v12 }
 0x2bb   :  { %713 = vmatpush.xpose.msk.msra.mxu1 %vm90_vm0, %v464_v7 }
 0x2be   :  { %714 = vmatmul.msk.f32.vlgmr.msra.gmra.mxu1 %vm90_vm0, %v383_v13  ;;  %v498_v15 = vld.sshfl [vmem:[#allocation1] sm:$0xff pattern:$0x75316420]  ;;  %v441_v34 = vpop.f32.mrf.mxu3 }
 0x2bf   :  { %549 = vst [vmem:[#allocation1] ss:$2 sm:$0xff] %v438_v32  ;;  %v457_v39 = vrot.slane %v441_v34, 4 }
 0x2c0   :  { %v499_v14 = vld.sshfl [vmem:[#allocation1 + $0x10] sm:$0xff pattern:$0x75316420]  ;;  %551 = vst [vmem:[#allocation1 + $0x1] ss:$2 sm:$0xff] %v456_v2 }
 0x2c1   :  { %715 = vmatpush.xpose.msk.msra.mxu2 %vm90_vm0, %v499_v14  ;;  %553 = vst [vmem:[#allocation1 + $0x10] ss:$2 sm:$0xff] %v441_v34 }
 0x2c5   :  { %716 = vmatpush.xpose.msk.msra.mxu2 %vm90_vm0, %v498_v15 }
 0x2c6   :  { %v444_v40 = vpop.f32.mrf.mxu3 }
 0x2c7   :  { %v458_v42 = vrot.slane %v444_v40, 4  ;;  %v554_v43 = vld.sshfl [vmem:[#allocation1] sm:$0xff pattern:$0x75316420] }
 0x2c8   :  { %717 = vmatmul.msk.f32.vlgmr.msra.gmra.mxu2 %vm90_vm0, %v386_v16  ;;  %v555_v41 = vld.sshfl [vmem:[#allocation1 + $0x10] sm:$0xff pattern:$0x75316420]  ;;  %582 = vst [vmem:[#allocation1] ss:$2 sm:$0xff] %v457_v39 }
 0x2c9   :  { %718 = vmatpush.msk.msrb.mxu1 %vm268_vm3, %v555_v41  ;;  %586 = vst [vmem:[#allocation1 + $0x10] ss:$2 sm:$0xff] %v458_v42 }
 0x2ca   :  { %584 = vst [vmem:[#allocation1 + $0x1] ss:$2 sm:$0xff] %v444_v40 }
 0x2cb   :  { %577 = vmatpush.msrb.mxu1 %v554_v43 }
 0x2d0   :  { %v588_v44 = vld.sshfl [vmem:[#allocation1 + $0x10] sm:$0xff pattern:$0x75316420] }
 0x2d1   :  { %720 = vmatpush.msk.msrb.mxu2 %vm268_vm3, %v588_v44  ;;  %v587_v45 = vld.sshfl [vmem:[#allocation1] sm:$0xff pattern:$0x75316420] }
 0x2d3   :  { %610 = vmatpush.msrb.mxu2 %v587_v45 }
 0x31c   :  { %v351_v18 = vpop.f32.mrf.mxu1 }
 0x31d   :  { %v357_v19 = vadd.f32 %v351_v18, %v324_v17 }
 0x31f   :  { %359 = vst.msk [vmem:[#allocation2] sm:$0xff] %vm52_vm1, %v357_v19 }
 0x326   :  { %v615_v56 = vld [vmem:[#allocation2] sm:$0xff] }
 0x32c   :  { %v354_v21 = vpop.f32.mrf.mxu1 }
 0x32d   :  { %v358_v22 = vadd.f32 %v354_v21, %v325_v20 }
 0x32f   :  { %360 = vst.msk [vmem:[#allocation2 + $0x8] sm:$0xff] %vm52_vm1, %v358_v22 }
 0x336   :  { %v616_v60 = vld [vmem:[#allocation2 + $0x8] sm:$0xff] }
 0x33b   :  { %v490_v25 = vpop.f32.mrf.mxu1 }
 0x33c   :  { %v527_v26 = vsel %vm234_vm2, %v490_v25, -inf }
 0x33d   :  { %528 = vmax.xlane.f32.xlu2 %v527_v26 }
 0x34b   :  { %v524_v27 = vpop.f32.mrf.mxu2 }
 0x34c   :  { %v530_v28 = vsel %vm234_vm2, %v524_v27, -inf }
 0x34d   :  { %531 = vmax.xlane.f32.xlu2 %v530_v28 }
 0x3b0   :  { %v529_v29 = vpop.xlane.xlu2 %528 }
 0x3b1   :  { %v533_v30 = vsub.f32 %v490_v25, %v529_v29 }
 0x3b3   :  { %v535_v31 = vmul.f32 1.442695, %v533_v30 }
 0x3b5   :  { %743 = vpow2.f32 %v535_v31 }
 0x3bb   :  { %v744_v9 = vpop.eup %743 }
 0x3bc   :  { %v539_v33 = vsel %vm234_vm2, %v744_v9, 0.0 }
 0x3bd   :  { %540 = vadd.xlane.f32.xlu0 %v539_v33 }
 0x3c0   :  { %v532_v35 = vpop.xlane.xlu2 %531 }
 0x3c1   :  { %v534_v10 = vsub.f32 %v524_v27, %v532_v35 }
 0x3c3   :  { %v537_v36 = vmul.f32 1.442695, %v534_v10 }
 0x3c5   :  { %745 = vpow2.f32 %v537_v36 }
 0x3cb   :  { %v746_v37 = vpop.eup %745 }
 0x3cc   :  { %v542_v38 = vsel %vm234_vm2, %v746_v37, 0.0 }
 0x3cd   :  { %543 = vadd.xlane.f32.xlu1 %v542_v38 }
 0x430   :  { %v541_v47 = vpop.xlane.xlu0 %540 }
 0x431   :  { %747 = vrcp.f32 %v541_v47 }
 0x437   :  { %v748_v48 = vpop.eup %747 }
 0x438   :  { %v547_v49 = vmul.f32 %v748_v48, %v744_v9 }
 0x43a   :  { %719 = vmatmul.msk.f32.vlgmr.msrb.gmra.mxu1 %vm234_vm2, %v547_v49 }
 0x440   :  { %v544_v50 = vpop.xlane.xlu1 %543 }
 0x441   :  { %749 = vrcp.f32 %v544_v50 }
 0x447   :  { %v750_v51 = vpop.eup %749 }
 0x448   :  { %v548_v52 = vmul.f32 %v750_v51, %v746_v37 }
 0x44a   :  { %721 = vmatmul.msk.f32.vlgmr.msrb.gmra.mxu2 %vm234_vm2, %v548_v52 }
 0x4b7   :  { %v579_v54 = vpop.f32.mrf.mxu1 }
 0x4b8   :  { %724 = vmatmul.msk.f32.vlgmr.msrb.gmra.mxu0 %vm90_vm0, %v579_v54 }
 0x4cd   :  { %v612_v55 = vpop.f32.mrf.mxu2 }
 0x4ce   :  { %725 = vmatmul.msk.f32.gmra.mxu0 %vm90_vm0, %v612_v55 }
 0x535   :  { %v643_v57 = vpop.f32.mrf.mxu0 }
 0x536   :  { %v649_v58 = vadd.f32 %v643_v57, %v615_v56 }
 0x538   :  { %651 = vst.msk [vmem:[#allocation2] sm:$0xff] %vm52_vm1, %v649_v58 }
 0x53f   :  { %v653_v59 = vld [vmem:[#allocation2] sm:$0xff] }
 0x540   :  { %655 = vst.msk [vmem:[#allocation6] sm:$0xff] %vm52_vm1, %v653_v59 }
 0x54b   :  { %v646_v61 = vpop.f32.mrf.mxu0 }
 0x54c   :  { %v650_v62 = vadd.f32 %v646_v61, %v616_v60 }
 0x54e   :  { %652 = vst.msk [vmem:[#allocation2 + $0x8] sm:$0xff] %vm52_vm1, %v650_v62 }
 0x555   :  { %v654_v63 = vld [vmem:[#allocation2 + $0x8] sm:$0xff] }
 0x556   :  { %656 = vst.msk [vmem:[#allocation6 + $0x8] sm:$0xff] %vm52_vm1, %v654_v63 }
 0x557   :  { %669 = dma.vmem_to_hbm [thread:$0]  %s662_s27, 256, %s664_s9, [#allocation5], %s804_s29, %s804_s29, %s805_s30  }
 0x558   :  { %801 = dma.done.wait [#allocation5], 256  }
 0x559   :  { %802 = vsyncadd [#allocation5], 4294967040 }
 0x55a   :  { %674 = vsyncpa [#allocation4], 1 }
 0x55b   :  { %675 = vsyncpa [#allocation5], 1 }

</bundles_post_ra>
